<compile_context>
chip_gen: v7x
topology: tpu7x:2x2x1
jax: 0.10.0
libtpu: 0.0.40
codegen_flags: <defaults>
</compile_context>

<pallas_src>
import functools

import jax
import jax.numpy as jnp
from jax.experimental import pallas as pl
from jax.experimental.pallas import tpu as pltpu

LANE = 128  # lane-dense width used for the padded tail layers / output


# ---------------------------------------------------------------------------
# Index maps (module-level: no Python late-binding hazards).
# ---------------------------------------------------------------------------
def _batch_index_map(i):
    return (i, 0)


def _resident_index_map(i):
    return (0, 0)


# ---------------------------------------------------------------------------
# Kernel
# ---------------------------------------------------------------------------
def dqnet_kernel(x_ref,
                 w1_ref, b1_ref,
                 w2_ref, b2_ref,
                 w3_ref, b3_ref,
                 w4_ref, b4_ref,
                 w5_ref, b5_ref,
                 o_ref):
    """One batch tile of the fused 5-layer MLP forward pass."""
    x = x_ref[...]            # (TB, 2) f32
    w1 = w1_ref[...]          # (2, 128) f32

    # Layer 1: K=2 contraction on the VPU (two broadcast multiplies + add).
    h = x[:, 0:1] * w1[0:1, :] + x[:, 1:2] * w1[1:2, :] + b1_ref[...]
    h = jnp.maximum(h, 0.0)

    # Layers 2-4: bf16 MXU matmuls, f32 accumulation, f32 bias add + ReLU.
    h = jnp.dot(h.astype(jnp.bfloat16), w2_ref[...],
                preferred_element_type=jnp.float32) + b2_ref[...]
    h = jnp.maximum(h, 0.0)

    h = jnp.dot(h.astype(jnp.bfloat16), w3_ref[...],
                preferred_element_type=jnp.float32) + b3_ref[...]
    h = jnp.maximum(h, 0.0)

    h = jnp.dot(h.astype(jnp.bfloat16), w4_ref[...],
                preferred_element_type=jnp.float32) + b4_ref[...]
    h = jnp.maximum(h, 0.0)

    # Layer 5 (no ReLU): kept in f32 for accuracy; padded to 128 output lanes
    # so the store stays lane-dense / unmasked.
    h = jnp.dot(h, w5_ref[...], preferred_element_type=jnp.float32) + b5_ref[...]

    o_ref[...] = h.astype(o_ref.dtype)


# ---------------------------------------------------------------------------
# Parameter preparation (hoisted out of the per-forward hot path).
# ---------------------------------------------------------------------------
def _pad_cols(a, n):
    pad = n - a.shape[-1]
    return jnp.pad(a, ((0, 0), (0, pad))) if pad > 0 else a


def _pad_rows(a, n):
    pad = n - a.shape[0]
    return jnp.pad(a, ((0, pad), (0, 0))) if pad > 0 else a


def prepare_dqnet_params(params):
    """Cast/pad f32 master params into kernel layout. Call once per update.

    Returns (kernel_params tuple, out_size).
    """
    (w1, b1), (w2, b2), (w3, b3), (w4, b4), (w5, b5) = params
    out_size = w5.shape[1]
    kp = []
    # Layer 1 stays f32 (VPU path).
    kp += [w1.astype(jnp.float32), b1.astype(jnp.float32)]
    # Layers 2-3: bf16 weights, f32 biases.
    kp += [w2.astype(jnp.bfloat16), b2.astype(jnp.float32)]
    kp += [w3.astype(jnp.bfloat16), b3.astype(jnp.float32)]
    # Layer 4: pad 64 -> 128 output lanes (zero columns).
    kp += [_pad_cols(w4, LANE).astype(jnp.bfloat16),
           _pad_cols(b4, LANE).astype(jnp.float32)]
    # Layer 5: stay f32, pad rows 64 -> 128 and cols out_size -> 128.
    kp += [_pad_cols(_pad_rows(w5, LANE), LANE).astype(jnp.float32),
           _pad_cols(b5, LANE).astype(jnp.float32)]
    return tuple(jax.device_put(p) for p in kp), out_size


# ---------------------------------------------------------------------------
# Tile / grid selection
# ---------------------------------------------------------------------------
def _cdiv(a, b):
    return -(-a // b)


def _round_up(a, b):
    return _cdiv(a, b) * b


def _detect_num_tensorcores():
    """Number of TensorCores per JAX device (1 on v5e/v6e; 2 on megacore parts)."""
    try:
        return max(1, int(getattr(jax.devices()[0], "num_cores", 1)))
    except Exception:
        return 1


def _choose_tiling(batch, num_tiles, max_tile):
    max_tile = max(8, _round_up(max_tile, 8))
    tb = _round_up(_cdiv(batch, max(1, num_tiles)), 8)
    tb = min(tb, max_tile)
    n_steps = _cdiv(batch, tb)
    return tb, n_steps, tb * n_steps


# ---------------------------------------------------------------------------
# Forward
# ---------------------------------------------------------------------------
@functools.partial(jax.jit, static_argnames=("out_size", "num_tiles", "max_tile"))
def _dqnet_forward_impl(x, kernel_params, *, out_size, num_tiles, max_tile):
    B, in_features = x.shape
    tb, n_steps, b_pad = _choose_tiling(B, num_tiles, max_tile)

    x_p = x.astype(jnp.float32)
    if b_pad != B:
        x_p = jnp.pad(x_p, ((0, b_pad - B), (0, 0)))

    in_specs = [pl.BlockSpec((tb, in_features), _batch_index_map)]
    for arr in kernel_params:
        # Constant index map -> weight/bias stays VMEM-resident across steps.
        in_specs.append(pl.BlockSpec(arr.shape, _resident_index_map))

    out_padded = pl.pallas_call(
        dqnet_kernel,
        out_shape=jax.ShapeDtypeStruct((b_pad, LANE), jnp.float32),
        grid=(n_steps,),
        in_specs=in_specs,
        out_specs=pl.BlockSpec((tb, LANE), _batch_index_map),
        compiler_params=pltpu.CompilerParams(
            dimension_semantics=("parallel",)),
    )(x_p, *kernel_params)

    # Slice off batch padding and zero-padded output lanes (fused under jit).
    return out_padded[:B, :out_size]


def dqnet_forward(x, kernel_params, out_size, *, num_tiles=None, max_tile=2048):
    """kernel_params: output of prepare_dqnet_params. num_tiles defaults to the
    number of TensorCores per device (so megacore parts get 2 balanced tiles)."""
    if num_tiles is None:
        num_tiles = _detect_num_tensorcores()
    return _dqnet_forward_impl(
        x, tuple(kernel_params),
        out_size=int(out_size), num_tiles=int(num_tiles), max_tile=int(max_tile))


# ---------------------------------------------------------------------------
# Init / reference
# ---------------------------------------------------------------------------
def init_dqnet_params(key, input_size=2, output_size=4):
    """Deterministic init mimicking nn.Linear default (uniform +/- 1/sqrt(fan_in))."""
    sizes = [input_size, 128, 128, 128, 64, output_size]
    params = []
    for i in range(len(sizes) - 1):
        fan_in, fan_out = sizes[i], sizes[i + 1]
        key, kw, kb = jax.random.split(key, 3)
        bound = 1.0 / jnp.sqrt(fan_in)
        W = jax.random.uniform(kw, (fan_in, fan_out), jnp.float32, -bound, bound)
        b = jax.random.uniform(kb, (1, fan_out), jnp.float32, -bound, bound)
        params.append((W, b))
    return params


def dqnet_reference(x, params):
    """Full-f32 reference (original nn.Module semantics)."""
    h = x.astype(jnp.float32)
    for i, (W, b) in enumerate(params):
        h = h @ W + b
        if i < len(params) - 1:
            h = jnp.maximum(h, 0.0)
    return h


# ---------------------------------------------------------------------------
if __name__ == "__main__":
    key = jax.random.PRNGKey(0)
    key, kx = jax.random.split(key)

    batch = 64            # small DQN-style batch; 2 state features in -> 4 Q-values out
    input_size = 2
    output_size = 4       # len(MDP_.actions) for a small synthetic MDP

    x = jax.random.normal(kx, (batch, input_size), dtype=jnp.float32)
    params = init_dqnet_params(key, input_size=input_size, output_size=output_size)

    # Padding / bf16 casting done once, outside the per-call hot path.
    kernel_params, out_size = prepare_dqnet_params(params)

    out = dqnet_forward(x, kernel_params, out_size)
    out = jax.block_until_ready(out)

    ref = dqnet_reference(x, params)
    assert out.shape == (batch, output_size)
    # Tolerance relaxed for bf16 hidden-layer weights (f32 accumulation + f32 final layer).
    assert jnp.allclose(out, ref, atol=5e-2, rtol=5e-2), "mismatch vs reference"

    print("KERNEL_OK")
</pallas_src>

<mosaic_0001>
module attributes {stable_mosaic.version = 11 : i64} {
  func.func @dqnet_kernel(%arg0: i32, %arg1: memref<64x2xf32, #tpu.memory_space<vmem>>, %arg2: memref<2x128xf32, #tpu.memory_space<vmem>>, %arg3: memref<1x128xf32, #tpu.memory_space<vmem>>, %arg4: memref<128x128xbf16, #tpu.memory_space<vmem>>, %arg5: memref<1x128xf32, #tpu.memory_space<vmem>>, %arg6: memref<128x128xbf16, #tpu.memory_space<vmem>>, %arg7: memref<1x128xf32, #tpu.memory_space<vmem>>, %arg8: memref<128x128xbf16, #tpu.memory_space<vmem>>, %arg9: memref<1x128xf32, #tpu.memory_space<vmem>>, %arg10: memref<128x128xf32, #tpu.memory_space<vmem>>, %arg11: memref<1x128xf32, #tpu.memory_space<vmem>>, %arg12: memref<64x128xf32, #tpu.memory_space<vmem>>) attributes {dimension_semantics = [#tpu.dimension_semantics<parallel>], iteration_bounds = array<i64: 1>, scalar_prefetch = 0 : i64, scratch_operands = 0 : i64, tpu.core_type = #tpu.core_type<tc>, window_params = [{transform_indices = @transform_0, window_bounds = array<i64: 64, 2>}, {pipeline_mode = #tpu.pipeline_mode<synchronous>, transform_indices = @transform_1, window_bounds = array<i64: 2, 128>}, {pipeline_mode = #tpu.pipeline_mode<synchronous>, transform_indices = @transform_2, window_bounds = array<i64: 1, 128>}, {pipeline_mode = #tpu.pipeline_mode<synchronous>, transform_indices = @transform_3, window_bounds = array<i64: 128, 128>}, {pipeline_mode = #tpu.pipeline_mode<synchronous>, transform_indices = @transform_4, window_bounds = array<i64: 1, 128>}, {pipeline_mode = #tpu.pipeline_mode<synchronous>, transform_indices = @transform_5, window_bounds = array<i64: 128, 128>}, {pipeline_mode = #tpu.pipeline_mode<synchronous>, transform_indices = @transform_6, window_bounds = array<i64: 1, 128>}, {pipeline_mode = #tpu.pipeline_mode<synchronous>, transform_indices = @transform_7, window_bounds = array<i64: 128, 128>}, {pipeline_mode = #tpu.pipeline_mode<synchronous>, transform_indices = @transform_8, window_bounds = array<i64: 1, 128>}, {pipeline_mode = #tpu.pipeline_mode<synchronous>, transform_indices = @transform_9, window_bounds = array<i64: 128, 128>}, {pipeline_mode = #tpu.pipeline_mode<synchronous>, transform_indices = @transform_10, window_bounds = array<i64: 1, 128>}, {transform_indices = @transform_11, window_bounds = array<i64: 64, 128>}]} {
    %c0 = arith.constant 0 : index
    %c0_0 = arith.constant 0 : index
    %0 = vector.load %arg1[%c0, %c0_0] : memref<64x2xf32, #tpu.memory_space<vmem>>, vector<64x2xf32>
    %c0_1 = arith.constant 0 : index
    %c0_2 = arith.constant 0 : index
    %1 = vector.load %arg2[%c0_1, %c0_2] : memref<2x128xf32, #tpu.memory_space<vmem>>, vector<2x128xf32>
    %2 = vector.extract_strided_slice %0 {offsets = [0, 0], sizes = [64, 1], strides = [1, 1]} : vector<64x2xf32> to vector<64x1xf32>
    %3 = vector.extract_strided_slice %1 {offsets = [0, 0], sizes = [1, 128], strides = [1, 1]} : vector<2x128xf32> to vector<1x128xf32>
    %4 = vector.broadcast %2 : vector<64x1xf32> to vector<64x128xf32>
    %5 = vector.broadcast %3 : vector<1x128xf32> to vector<64x128xf32>
    %6 = arith.mulf %4, %5 : vector<64x128xf32>
    %7 = vector.extract_strided_slice %0 {offsets = [0, 1], sizes = [64, 1], strides = [1, 1]} : vector<64x2xf32> to vector<64x1xf32>
    %8 = vector.extract_strided_slice %1 {offsets = [1, 0], sizes = [1, 128], strides = [1, 1]} : vector<2x128xf32> to vector<1x128xf32>
    %9 = vector.broadcast %7 : vector<64x1xf32> to vector<64x128xf32>
    %10 = vector.broadcast %8 : vector<1x128xf32> to vector<64x128xf32>
    %11 = arith.mulf %9, %10 : vector<64x128xf32>
    %12 = arith.addf %6, %11 : vector<64x128xf32>
    %c0_3 = arith.constant 0 : index
    %c0_4 = arith.constant 0 : index
    %13 = vector.load %arg3[%c0_3, %c0_4] : memref<1x128xf32, #tpu.memory_space<vmem>>, vector<1x128xf32>
    %14 = vector.broadcast %13 : vector<1x128xf32> to vector<64x128xf32>
    %15 = arith.addf %12, %14 : vector<64x128xf32>
    %cst = arith.constant 0.000000e+00 : f32
    %16 = vector.broadcast %cst : f32 to vector<64x128xf32>
    %17 = arith.maximumf %15, %16 : vector<64x128xf32>
    %18 = arith.truncf %17 : vector<64x128xf32> to vector<64x128xbf16>
    %c0_5 = arith.constant 0 : index
    %c0_6 = arith.constant 0 : index
    %19 = vector.load %arg4[%c0_5, %c0_6] : memref<128x128xbf16, #tpu.memory_space<vmem>>, vector<128x128xbf16>
    %cst_7 = arith.constant dense<0.000000e+00> : vector<64x128xf32>
    %20 = tpu.matmul %18, %19, %cst_7 {dimension_numbers = #tpu.dot_dimension_numbers<[1], [0], [0], [1], [0, 0, 1, 1], [], []>} : vector<64x128xbf16>, vector<128x128xbf16>, vector<64x128xf32> -> vector<64x128xf32>
    %c0_8 = arith.constant 0 : index
    %c0_9 = arith.constant 0 : index
    %21 = vector.load %arg5[%c0_8, %c0_9] : memref<1x128xf32, #tpu.memory_space<vmem>>, vector<1x128xf32>
    %22 = vector.broadcast %21 : vector<1x128xf32> to vector<64x128xf32>
    %23 = arith.addf %20, %22 : vector<64x128xf32>
    %cst_10 = arith.constant 0.000000e+00 : f32
    %24 = vector.broadcast %cst_10 : f32 to vector<64x128xf32>
    %25 = arith.maximumf %23, %24 : vector<64x128xf32>
    %26 = arith.truncf %25 : vector<64x128xf32> to vector<64x128xbf16>
    %c0_11 = arith.constant 0 : index
    %c0_12 = arith.constant 0 : index
    %27 = vector.load %arg6[%c0_11, %c0_12] : memref<128x128xbf16, #tpu.memory_space<vmem>>, vector<128x128xbf16>
    %cst_13 = arith.constant dense<0.000000e+00> : vector<64x128xf32>
    %28 = tpu.matmul %26, %27, %cst_13 {dimension_numbers = #tpu.dot_dimension_numbers<[1], [0], [0], [1], [0, 0, 1, 1], [], []>} : vector<64x128xbf16>, vector<128x128xbf16>, vector<64x128xf32> -> vector<64x128xf32>
    %c0_14 = arith.constant 0 : index
    %c0_15 = arith.constant 0 : index
    %29 = vector.load %arg7[%c0_14, %c0_15] : memref<1x128xf32, #tpu.memory_space<vmem>>, vector<1x128xf32>
    %30 = vector.broadcast %29 : vector<1x128xf32> to vector<64x128xf32>
    %31 = arith.addf %28, %30 : vector<64x128xf32>
    %cst_16 = arith.constant 0.000000e+00 : f32
    %32 = vector.broadcast %cst_16 : f32 to vector<64x128xf32>
    %33 = arith.maximumf %31, %32 : vector<64x128xf32>
    %34 = arith.truncf %33 : vector<64x128xf32> to vector<64x128xbf16>
    %c0_17 = arith.constant 0 : index
    %c0_18 = arith.constant 0 : index
    %35 = vector.load %arg8[%c0_17, %c0_18] : memref<128x128xbf16, #tpu.memory_space<vmem>>, vector<128x128xbf16>
    %cst_19 = arith.constant dense<0.000000e+00> : vector<64x128xf32>
    %36 = tpu.matmul %34, %35, %cst_19 {dimension_numbers = #tpu.dot_dimension_numbers<[1], [0], [0], [1], [0, 0, 1, 1], [], []>} : vector<64x128xbf16>, vector<128x128xbf16>, vector<64x128xf32> -> vector<64x128xf32>
    %c0_20 = arith.constant 0 : index
    %c0_21 = arith.constant 0 : index
    %37 = vector.load %arg9[%c0_20, %c0_21] : memref<1x128xf32, #tpu.memory_space<vmem>>, vector<1x128xf32>
    %38 = vector.broadcast %37 : vector<1x128xf32> to vector<64x128xf32>
    %39 = arith.addf %36, %38 : vector<64x128xf32>
    %cst_22 = arith.constant 0.000000e+00 : f32
    %40 = vector.broadcast %cst_22 : f32 to vector<64x128xf32>
    %41 = arith.maximumf %39, %40 : vector<64x128xf32>
    %c0_23 = arith.constant 0 : index
    %c0_24 = arith.constant 0 : index
    %42 = vector.load %arg10[%c0_23, %c0_24] : memref<128x128xf32, #tpu.memory_space<vmem>>, vector<128x128xf32>
    %cst_25 = arith.constant dense<0.000000e+00> : vector<64x128xf32>
    %43 = tpu.matmul %41, %42, %cst_25 {dimension_numbers = #tpu.dot_dimension_numbers<[1], [0], [0], [1], [0, 0, 1, 1], [], []>} : vector<64x128xf32>, vector<128x128xf32>, vector<64x128xf32> -> vector<64x128xf32>
    %c0_26 = arith.constant 0 : index
    %c0_27 = arith.constant 0 : index
    %44 = vector.load %arg11[%c0_26, %c0_27] : memref<1x128xf32, #tpu.memory_space<vmem>>, vector<1x128xf32>
    %45 = vector.broadcast %44 : vector<1x128xf32> to vector<64x128xf32>
    %46 = arith.addf %43, %45 : vector<64x128xf32>
    %c0_28 = arith.constant 0 : index
    %c0_29 = arith.constant 0 : index
    %47 = vector.load %arg12[%c0_28, %c0_29] : memref<64x128xf32, #tpu.memory_space<vmem>>, vector<64x128xf32>
    tpu.vector_store %arg12[%c0_28, %c0_29], %46 {strides = array<i32>} : memref<64x128xf32, #tpu.memory_space<vmem>>, vector<64x128xf32>,
    return
  }
  func.func @transform_0(%arg0: i32) -> (i32, i32) {
    %c0_i32 = arith.constant 0 : i32
    %c0_i32_0 = arith.constant 0 : i32
    return %arg0, %c0_i32 : i32, i32
  }
  func.func @transform_1(%arg0: i32) -> (i32, i32) {
    %c0_i32 = arith.constant 0 : i32
    %c0_i32_0 = arith.constant 0 : i32
    %c0_i32_1 = arith.constant 0 : i32
    return %c0_i32, %c0_i32_0 : i32, i32
  }
  func.func @transform_2(%arg0: i32) -> (i32, i32) {
    %c0_i32 = arith.constant 0 : i32
    %c0_i32_0 = arith.constant 0 : i32
    %c0_i32_1 = arith.constant 0 : i32
    return %c0_i32, %c0_i32_0 : i32, i32
  }
  func.func @transform_3(%arg0: i32) -> (i32, i32) {
    %c0_i32 = arith.constant 0 : i32
    %c0_i32_0 = arith.constant 0 : i32
    %c0_i32_1 = arith.constant 0 : i32
    return %c0_i32, %c0_i32_0 : i32, i32
  }
  func.func @transform_4(%arg0: i32) -> (i32, i32) {
    %c0_i32 = arith.constant 0 : i32
    %c0_i32_0 = arith.constant 0 : i32
    %c0_i32_1 = arith.constant 0 : i32
    return %c0_i32, %c0_i32_0 : i32, i32
  }
  func.func @transform_5(%arg0: i32) -> (i32, i32) {
    %c0_i32 = arith.constant 0 : i32
    %c0_i32_0 = arith.constant 0 : i32
    %c0_i32_1 = arith.constant 0 : i32
    return %c0_i32, %c0_i32_0 : i32, i32
  }
  func.func @transform_6(%arg0: i32) -> (i32, i32) {
    %c0_i32 = arith.constant 0 : i32
    %c0_i32_0 = arith.constant 0 : i32
    %c0_i32_1 = arith.constant 0 : i32
    return %c0_i32, %c0_i32_0 : i32, i32
  }
  func.func @transform_7(%arg0: i32) -> (i32, i32) {
    %c0_i32 = arith.constant 0 : i32
    %c0_i32_0 = arith.constant 0 : i32
    %c0_i32_1 = arith.constant 0 : i32
    return %c0_i32, %c0_i32_0 : i32, i32
  }
  func.func @transform_8(%arg0: i32) -> (i32, i32) {
    %c0_i32 = arith.constant 0 : i32
    %c0_i32_0 = arith.constant 0 : i32
    %c0_i32_1 = arith.constant 0 : i32
    return %c0_i32, %c0_i32_0 : i32, i32
  }
  func.func @transform_9(%arg0: i32) -> (i32, i32) {
    %c0_i32 = arith.constant 0 : i32
    %c0_i32_0 = arith.constant 0 : i32
    %c0_i32_1 = arith.constant 0 : i32
    return %c0_i32, %c0_i32_0 : i32, i32
  }
  func.func @transform_10(%arg0: i32) -> (i32, i32) {
    %c0_i32 = arith.constant 0 : i32
    %c0_i32_0 = arith.constant 0 : i32
    %c0_i32_1 = arith.constant 0 : i32
    return %c0_i32, %c0_i32_0 : i32, i32
  }
  func.func @transform_11(%arg0: i32) -> (i32, i32) {
    %c0_i32 = arith.constant 0 : i32
    %c0_i32_0 = arith.constant 0 : i32
    return %arg0, %c0_i32 : i32, i32
  }
}

</mosaic_0001>

<bundles_post_ra>
// kernel: _dqnet_forward_impl.1
= control target key start
LH: loop header
LB: loop body
LE: loop exit
PB: predicated region body
PF: predicated region fallthrough
CT: control target
= control target key end

     0   :  { %16 = vsyncpa [#allocation3], 0  ;;  %s1355_s0 = inlined_call_operand.vmem [shape: f32[64,2], index: 0, kind: input, shape index: {}]   ;;  %s1356_s1 = inlined_call_operand.vmem [shape: f32[2,128], index: 1, kind: input, shape index: {}]   ;;  %s1357_s2 = inlined_call_operand.vmem [shape: f32[1,128], index: 2, kind: input, shape index: {}]   ;;  %s1358_s3 = inlined_call_operand.vmem [shape: bf16[128,128], index: 3, kind: input, shape index: {}]   ;;  %s1359_s4 = inlined_call_operand.vmem [shape: f32[1,128], index: 4, kind: input, shape index: {}]   ;;  %s1360_s5 = inlined_call_operand.hbm [shape: bf16[128,128], index: 5, kind: input, shape index: {}]   ;;  %s1361_s6 = inlined_call_operand.vmem [shape: f32[1,128], index: 6, kind: input, shape index: {}]   ;;  %s1362_s7 = inlined_call_operand.hbm [shape: bf16[128,128], index: 7, kind: input, shape index: {}]   ;;  %s1363_s8 = inlined_call_operand.vmem [shape: f32[1,128], index: 8, kind: input, shape index: {}]   ;;  %s1364_s9 = inlined_call_operand.hbm [shape: f32[128,128], index: 9, kind: input, shape index: {}]   ;;  %s1365_s10 = inlined_call_operand.vmem [shape: f32[1,128], index: 10, kind: input, shape index: {}]   ;;  %s1366_s11 = inlined_call_operand.vmem [shape: f32[64,128], index: 11, kind: output, shape index: {}]  }
   0x1   :  { %17 = vsyncpa [#allocation5], 0  ;;  %s1153_s17 = smov [#allocation4]   ;;  %s1154_s19 = smov [#allocation2]  }
   0x2   :  { %s47_s18 = sshll.u32 %s1153_s17, 4  ;;  %s33_s20 = sshll.u32 %s1154_s19, 4  ;;  %s48_s18 = int_to_ptr.vmem [resolvable:$true] %s47_s18  ;;  %s1222_s20 = int_to_ptr.vmem [resolvable:$true] %s33_s20 }
   0x3   :  { %s1083_s23 = scalar_lea.hbm %s1362_s7, 1024 }
   0x4   :  { %p1084_p0 = scmp.ne.s32.totalorder %s1362_s7, %s1083_s23  ;;  %p1087_p1 = scmp.lt.u32.totalorder %s1083_s23, %s1362_s7 }
   0x6   :  { %p1089_p2 = pnand %p1087_p1, %p1084_p0 }
   0x8   :  { %1092 = shalt.err (!%p1089_p2)
}
   0x9   :  { %s1093_s28 = scalar_lea.vmem %s48_s18, 1024  ;;  %p1098_p4 = scmp.lt.s32.totalorder %s48_s18, %s48_s18 }
   0xa   :  { %p1094_p3 = scmp.ne.s32.totalorder %s48_s18, %s1093_s28  ;;  %p1099_p5 = scmp.lt.s32.totalorder %s1093_s28, %s1093_s28 }
   0xc   :  { %p1100_p6 = por %p1099_p5, %p1098_p4 }
   0xe   :  { %p1101_p7 = pnand %p1100_p6, %p1094_p3 }
  0x10   :  { %1104 = shalt.err (!%p1101_p7)
}
  0x11   :  { %s1155_s29 = smov 64   ;;  %s1156_s30 = smov 4  }
  0x12   :  { %53 = dma.hbm_to_vmem [thread:$0]  %s1362_s7, 1024, %s48_s18, [#allocation5], %s1155_s29, %s1155_s29, %s1156_s30  }
  0x13   :  { %s1105_s16 = scalar_lea.hbm %s1360_s5, 1024 }
  0x14   :  { %p1106_p8 = scmp.ne.s32.totalorder %s1360_s5, %s1105_s16  ;;  %p1109_p9 = scmp.lt.u32.totalorder %s1105_s16, %s1360_s5 }
  0x16   :  { %p1111_p10 = pnand %p1109_p9, %p1106_p8 }
  0x18   :  { %1114 = shalt.err (!%p1111_p10)
}
  0x19   :  { %s1115_s23 = scalar_lea.vmem %s1222_s20, 1024  ;;  %p1120_p12 = scmp.lt.s32.totalorder %s1222_s20, %s1222_s20 }
  0x1a   :  { %p1116_p11 = scmp.ne.s32.totalorder %s1222_s20, %s1115_s23  ;;  %p1121_p13 = scmp.lt.s32.totalorder %s1115_s23, %s1115_s23 }
  0x1c   :  { %p1122_p0 = por %p1121_p13, %p1120_p12 }
  0x1e   :  { %p1123_p1 = pnand %p1122_p0, %p1116_p11 }
  0x20   :  { %1126 = shalt.err (!%p1123_p1)
}
  0x21   :  { %39 = dma.hbm_to_vmem [thread:$0]  %s1360_s5, 1024, %s1222_s20, [#allocation3], %s1155_s29, %s1155_s29, %s1156_s30  }
  0x22   :  { %s1157_s24 = smov [#allocation6]   ;;  %s1127_s28 = scalar_lea.hbm %s1364_s9, 2048 }
  0x23   :  { %s61_s25 = sshll.u32 %s1157_s24, 4  ;;  %p1128_p2 = scmp.ne.s32.totalorder %s1364_s9, %s1127_s28  ;;  %s62_s25 = int_to_ptr.vmem [resolvable:$true] %s61_s25 }
  0x24   :  { %p1131_p3 = scmp.lt.u32.totalorder %s1127_s28, %s1364_s9 }
  0x26   :  { %p1133_p4 = pnand %p1131_p3, %p1128_p2 }
  0x28   :  { %1136 = shalt.err (!%p1133_p4)
}
  0x29   :  { %s1137_s16 = scalar_lea.vmem %s62_s25, 2048  ;;  %p1142_p6 = scmp.lt.s32.totalorder %s62_s25, %s62_s25 }
  0x2a   :  { %p1138_p5 = scmp.ne.s32.totalorder %s62_s25, %s1137_s16  ;;  %p1143_p7 = scmp.lt.s32.totalorder %s1137_s16, %s1137_s16 }
  0x2c   :  { %p1144_p8 = por %p1143_p7, %p1142_p6 }
  0x2e   :  { %p1145_p9 = pnand %p1144_p8, %p1138_p5 }
  0x30   :  { %1148 = shalt.err (!%p1145_p9)
}
  0x31   :  { %s1158_s5 = smov 128   ;;  %s1159_s20 = smov 8  }
  0x32   :  { %67 = dma.hbm_to_vmem [thread:$0]  %s1364_s9, 2048, %s62_s25, [#allocation5], %s1158_s5, %s1158_s5, %s1159_s20  }
  0x33   :  { %1149 = dma.done.wait [#allocation3], 1024  }
  0x34   :  { %1150 = vsyncadd [#allocation3], 4294966272 }
  0x35   :  { %1151 = dma.done.wait [#allocation5], 3072  }
  0x36   :  { %1152 = vsyncadd [#allocation5], 4294964224  ;;  %v1160_v0 = vmov 1   ;;  %v1161_v1 = vmov 0   ;;  %v80_v2 = vld [vmem:[%s1355_s0] sm:$0xff]  ;;  %v81_v3 = vld [vmem:[%s1355_s0 + $0x8] sm:$0xff]  ;;  %v129_v24 = vlaneseq }
  0x37   :  { %1049 = vset.pattern.permute.xlu1 %v1160_v0  ;;  %1048 = vset.pattern.permute.xlu0 %v1161_v1  ;;  %v82_v4 = vld [vmem:[%s1355_s0 + $0x10] sm:$0xff]  ;;  %v1059_v5 = vld [vmem:[%s1358_s3] sm:$0xff]   ;;  %v1060_v6 = vld [vmem:[%s1358_s3 + $0x8] sm:$0xff]  }
  0x38   :  { %142 = vperm.xlu1 %1049, %v80_v2   ;;  %91 = vperm.xlu0 %1048, %v80_v2   ;;  %v83_v7 = vld [vmem:[%s1355_s0 + $0x18] sm:$0xff]  ;;  %v1061_v8 = vld [vmem:[%s1358_s3 + $0x10] sm:$0xff]   ;;  %v85_v10 = vld [vmem:[%s1355_s0 + $0x28] sm:$0xff]  ;;  %v130_v25 = vshrl.u32 %v129_v24, 7 }
  0x39   :  { %891 = vmatprep.subr.bf16.mxu0 %v1059_v5  ;;  %v1062_v9 = vld [vmem:[%s1358_s3 + $0x18] sm:$0xff]   ;;  %v84_v11 = vld [vmem:[%s1355_s0 + $0x20] sm:$0xff]  ;;  %v86_v13 = vld [vmem:[%s1355_s0 + $0x30] sm:$0xff] }
  0x3a   :  { %892 = vmatpush3.bf16.msra.mxu0 %v1059_v5  ;;  %v1063_v12 = vld [vmem:[%s1358_s3 + $0x20] sm:$0xff]   ;;  %v1064_v14 = vld [vmem:[%s1358_s3 + $0x28] sm:$0xff]   ;;  %v1065_v15 = vld [vmem:[%s1358_s3 + $0x30] sm:$0xff]   ;;  %v175_v26 = vsub.s32 1, %v130_v25  ;;  %v131_v27 = vsub.s32 0, %v130_v25 }
  0x3b   :  { %893 = vmatprep.subr.bf16.mxu0 %v1060_v6  ;;  %v1066_v16 = vld [vmem:[%s1358_s3 + $0x38] sm:$0xff]   ;;  %v1067_v18 = vld [vmem:[#allocation2] sm:$0xff]   ;;  %v1068_v19 = vld [vmem:[#allocation2 + $0x8] sm:$0xff]  }
  0x3c   :  { %146 = vperm.xlu1 %1049, %v81_v3   ;;  %1051 = vset.pattern.permute.xlu0 %v1160_v0  ;;  %v87_v17 = vld [vmem:[%s1355_s0 + $0x38] sm:$0xff]  ;;  %v1069_v20 = vld [vmem:[#allocation2 + $0x10] sm:$0xff]   ;;  %v1071_v22 = vld [vmem:[#allocation2 + $0x20] sm:$0xff]  }
  0x3d   :  { %150 = vperm.xlu0 %1051, %v82_v4   ;;  %915 = vmatprep.subr.bf16.mxu1 %v1067_v18  ;;  %v1070_v21 = vld [vmem:[#allocation2 + $0x18] sm:$0xff]   ;;  %v1072_v23 = vld [vmem:[#allocation2 + $0x28] sm:$0xff]   ;;  %v88_v28 = vld [vmem:[%s1356_s1] sm:$0x3] }
  0x3e   :  { %894 = vmatpush3.bf16.msra.mxu0 %v1060_v6  ;;  %916 = vmatpush3.bf16.msra.mxu1 %v1067_v18  ;;  %v176_v30 = vrot.slane %v88_v28, %v175_v26  ;;  %v132_v31 = vrot.slane %v88_v28, %v131_v27  ;;  %v802_v40 = vld [vmem:[%s1357_s2] ss:$0 sm:$0xff]  ;;  %v1073_v28 = vld [vmem:[#allocation2 + $0x30] sm:$0xff]  }
  0x3f   :  { %895 = vmatprep.subr.bf16.mxu0 %v1061_v8  ;;  %917 = vmatprep.subr.bf16.mxu1 %v1068_v19 }
  0x40   :  { %1050 = vset.pattern.permute.xlu1 %v1161_v1 }
  0x41   :  { %106 = vperm.xlu1 %1050, %v83_v7   ;;  %1052 = vset.pattern.permute.xlu0 %v1161_v1 }
  0x42   :  { %96 = vperm.xlu0 %1052, %v81_v3   ;;  %896 = vmatpush3.bf16.msra.mxu0 %v1061_v8 }
  0x43   :  { %897 = vmatprep.subr.bf16.mxu0 %v1062_v9  ;;  %918 = vmatpush3.bf16.msra.mxu1 %v1068_v19 }
  0x44   :  { %919 = vmatprep.subr.bf16.mxu1 %v1069_v20 }
  0x45   :  { %1053 = vset.pattern.permute.xlu1 %v1160_v0 }
  0x46   :  { %154 = vperm.xlu1 %1053, %v83_v7   ;;  %101 = vperm.xlu0 %1052, %v82_v4  }
  0x47   :  { %898 = vmatpush3.bf16.msra.mxu0 %v1062_v9  ;;  %920 = vmatpush3.bf16.msra.mxu1 %v1069_v20 }
  0x48   :  { %899 = vmatprep.subr.bf16.mxu0 %v1063_v12  ;;  %921 = vmatprep.subr.bf16.mxu1 %v1070_v21 }
  0x4a   :  { %1054 = vset.pattern.permute.xlu1 %v1161_v1  ;;  %116 = vperm.xlu0 %1052, %v85_v10  }
  0x4b   :  { %111 = vperm.xlu1 %1054, %v84_v11   ;;  %900 = vmatpush3.bf16.msra.mxu0 %v1063_v12 }
  0x4c   :  { %901 = vmatprep.subr.bf16.mxu0 %v1064_v14  ;;  %922 = vmatpush3.bf16.msra.mxu1 %v1070_v21 }
  0x4d   :  { %923 = vmatprep.subr.bf16.mxu1 %v1071_v22 }
  0x4e   :  { %121 = vperm.xlu0 %1052, %v86_v13  }
  0x4f   :  { %1055 = vset.pattern.permute.xlu1 %v1160_v0  ;;  %902 = vmatpush3.bf16.msra.mxu0 %v1064_v14 }
  0x50   :  { %158 = vperm.xlu1 %1055, %v84_v11   ;;  %903 = vmatprep.subr.bf16.mxu0 %v1065_v15 }
  0x51   :  { %924 = vmatpush3.bf16.msra.mxu1 %v1071_v22 }
  0x52   :  { %1057 = vset.pattern.permute.xlu0 %v1160_v0  ;;  %925 = vmatprep.subr.bf16.mxu1 %v1072_v23 }
  0x53   :  { %166 = vperm.xlu0 %1057, %v86_v13   ;;  %904 = vmatpush3.bf16.msra.mxu0 %v1065_v15 }
  0x54   :  { %162 = vperm.xlu1 %1055, %v85_v10   ;;  %905 = vmatprep.subr.bf16.mxu0 %v1066_v16 }
  0x55   :  { %926 = vmatpush3.bf16.msra.mxu1 %v1072_v23 }
  0x56   :  { %927 = vmatprep.subr.bf16.mxu1 %v1073_v28 }
  0x57   :  { %906 = vmatpush3.bf16.msra.mxu0 %v1066_v16 }
  0x58   :  { %1056 = vset.pattern.permute.xlu1 %v1161_v1 }
  0x59   :  { %126 = vperm.xlu1 %1056, %v87_v17   ;;  %928 = vmatpush3.bf16.msra.mxu1 %v1073_v28 }
  0x5d   :  { %1058 = vset.pattern.permute.xlu1 %v1160_v0 }
  0x5e   :  { %170 = vperm.xlu1 %1058, %v87_v17  }
  0xb7   :  { %v143_v29 = vpop.permute.xlu1 %142  ;;  %v92_v32 = vpop.permute.xlu0 %91 }
  0xb8   :  { %v177_v34 = vmul.f32 %v176_v30, %v143_v29  ;;  %v133_v35 = vmul.f32 %v132_v31, %v92_v32  ;;  %v1074_v29 = vld [vmem:[#allocation2 + $0x38] sm:$0xff]   ;;  %v1075_v32 = vld [vmem:[#allocation4] sm:$0xff]  }
  0xb9   :  { %929 = vmatprep.subr.bf16.mxu1 %v1074_v29  ;;  %939 = vmatprep.subr.bf16.mxu0 %v1075_v32 }
  0xba   :  { %v185_v37 = vadd.f32 %v177_v34, %v133_v35  ;;  %930 = vmatpush3.bf16.msra.mxu1 %v1074_v29  ;;  %v1079_v34 = vld [vmem:[#allocation4 + $0x20] sm:$0xff]   ;;  %v1080_v35 = vld [vmem:[#allocation4 + $0x28] sm:$0xff]  }
  0xbb   :  { %v147_v33 = vpop.permute.xlu1 %146 }
  0xbc   :  { %v151_v36 = vpop.permute.xlu0 %150  ;;  %v178_v41 = vmul.f32 %v176_v30, %v147_v33  ;;  %v200_v45 = vadd.f32 %v802_v40, %v185_v37  ;;  %v1076_v33 = vld [vmem:[#allocation4 + $0x8] sm:$0xff]  }
  0xbd   :  { %v179_v43 = vmul.f32 %v176_v30, %v151_v36  ;;  %v803_v36 = vld [vmem:[%s1359_s4] ss:$0 sm:$0xff] }
  0xbe   :  { %v208_v54 = vmax.f32 %v200_v45, 0.0 }
  0xc0   :  { %v107_v38 = vpop.permute.xlu1 %106 }
  0xc1   :  { %v97_v39 = vpop.permute.xlu0 %96  ;;  %v136_v48 = vmul.f32 %v132_v31, %v107_v38 }
  0xc2   :  { %v134_v42 = vmul.f32 %v132_v31, %v97_v39 }
  0xc4   :  { %v186_v44 = vadd.f32 %v178_v41, %v134_v42 }
  0xc5   :  { %v155_v46 = vpop.permute.xlu1 %154  ;;  %v102_v47 = vpop.permute.xlu0 %101 }
  0xc6   :  { %v180_v49 = vmul.f32 %v176_v30, %v155_v46  ;;  %v135_v50 = vmul.f32 %v132_v31, %v102_v47  ;;  %v201_v51 = vadd.f32 %v802_v40, %v186_v44 }
  0xc8   :  { %v188_v52 = vadd.f32 %v180_v49, %v136_v48  ;;  %v187_v53 = vadd.f32 %v179_v43, %v135_v50  ;;  %v209_v55 = vmax.f32 %v201_v51, 0.0 }
  0xc9   :  { %v117_v56 = vpop.permute.xlu0 %116 }
  0xca   :  { %v203_v57 = vadd.f32 %v802_v40, %v188_v52  ;;  %v202_v58 = vadd.f32 %v802_v40, %v187_v53  ;;  %v112_v59 = vpop.permute.xlu1 %111  ;;  %v216_v60 = vpack.c.bf16 %v209_v55, %v208_v54  ;;  %v138_v6 = vmul.f32 %v132_v31, %v117_v56 }
  0xcb   :  { %v137_v2 = vmul.f32 %v132_v31, %v112_v59 }
  0xcc   :  { %v211_v61 = vmax.f32 %v203_v57, 0.0  ;;  %v210_v62 = vmax.f32 %v202_v58, 0.0  ;;  %907 = vmatprep.mubr.bf16.mxu0 %v216_v60 }
  0xcd   :  { %v122_v0 = vpop.permute.xlu0 %121 }
  0xce   :  { %v217_v63 = vpack.c.bf16 %v211_v61, %v210_v62  ;;  %v139_v14 = vmul.f32 %v132_v31, %v122_v0 }
  0xcf   :  { %v159_v1 = vpop.permute.xlu1 %158 }
  0xd0   :  { %v181_v3 = vmul.f32 %v176_v30, %v159_v1  ;;  %908 = vmatmul.mubr.bf16.vlgmr.msra.gmra.mrb[0].mxu0 %v217_v63  ;;  %v1081_v1 = vld [vmem:[#allocation4 + $0x30] sm:$0xff]  }
  0xd1   :  { %940 = vmatpush3.bf16.msra.mxu0 %v1075_v32 }
  0xd2   :  { %v189_v4 = vadd.f32 %v181_v3, %v137_v2  ;;  %v167_v8 = vpop.permute.xlu0 %166  ;;  %941 = vmatprep.subr.bf16.mxu0 %v1076_v33  ;;  %v1082_v2 = vld [vmem:[#allocation4 + $0x38] sm:$0xff]   ;;  %v660_v3 = vld [vmem:[#allocation6] sm:$0xff] }
  0xd3   :  { %v163_v5 = vpop.permute.xlu1 %162  ;;  %v183_v11 = vmul.f32 %v176_v30, %v167_v8 }
  0xd4   :  { %v182_v7 = vmul.f32 %v176_v30, %v163_v5  ;;  %v204_v9 = vadd.f32 %v802_v40, %v189_v4  ;;  %v661_v4 = vld [vmem:[#allocation6 + $0x8] sm:$0xff]  ;;  %v662_v5 = vld [vmem:[#allocation6 + $0x10] sm:$0xff] }
  0xd5   :  { %v191_v17 = vadd.f32 %v183_v11, %v139_v14  ;;  %942 = vmatpush3.bf16.msra.mxu0 %v1076_v33 }
  0xd6   :  { %v190_v10 = vadd.f32 %v182_v7, %v138_v6  ;;  %v212_v15 = vmax.f32 %v204_v9, 0.0  ;;  %v1007_v6 = vpack.c.bf16 %v661_v4, %v660_v3  ;;  %v663_v7 = vld [vmem:[#allocation6 + $0x18] sm:$0xff]  ;;  %v664_v9 = vld [vmem:[#allocation6 + $0x20] sm:$0xff] }
  0xd7   :  { %v206_v22 = vadd.f32 %v802_v40, %v191_v17  ;;  %v1011_v8 = vpack.c.bf16 %v663_v7, %v662_v5 }
  0xd8   :  { %v205_v12 = vadd.f32 %v802_v40, %v190_v10  ;;  %v127_v13 = vpop.permute.xlu1 %126  ;;  %v665_v10 = vld [vmem:[#allocation6 + $0x28] sm:$0xff]  ;;  %1008 = vmatprep.subr.bf16.mxu1 %v1007_v6 }
  0xd9   :  { %v140_v20 = vmul.f32 %v132_v31, %v127_v13  ;;  %v214_v25 = vmax.f32 %v206_v22, 0.0  ;;  %v1078_v31 = vld [vmem:[#allocation4 + $0x18] sm:$0xff]   ;;  %v1015_v11 = vpack.c.bf16 %v665_v10, %v664_v9 }
  0xda   :  { %v213_v16 = vmax.f32 %v205_v12, 0.0  ;;  %v666_v12 = vld [vmem:[#allocation6 + $0x30] sm:$0xff]  ;;  %v667_v13 = vld [vmem:[#allocation6 + $0x38] sm:$0xff] }
  0xdb   :  { %v1019_v14 = vpack.c.bf16 %v667_v13, %v666_v12 }
  0xdc   :  { %v218_v18 = vpack.c.bf16 %v213_v16, %v212_v15  ;;  %v668_v15 = vld [vmem:[#allocation6 + $0x40] sm:$0xff]  ;;  %v669_v16 = vld [vmem:[#allocation6 + $0x48] sm:$0xff] }
  0xdd   :  { %v171_v19 = vpop.permute.xlu1 %170  ;;  %v1023_v17 = vpack.c.bf16 %v669_v16, %v668_v15 }
  0xde   :  { %v184_v21 = vmul.f32 %v176_v30, %v171_v19  ;;  %911 = vmatprep.mubr.bf16.mxu0 %v218_v18  ;;  %v1077_v30 = vld [vmem:[#allocation4 + $0x10] sm:$0xff]   ;;  %v671_v19 = vld [vmem:[#allocation6 + $0x58] sm:$0xff] }
  0xdf   :  { %943 = vmatprep.subr.bf16.mxu0 %v1077_v30  ;;  %v670_v18 = vld [vmem:[#allocation6 + $0x50] sm:$0xff] }
  0xe0   :  { %v192_v23 = vadd.f32 %v184_v21, %v140_v20  ;;  %944 = vmatpush3.bf16.msra.mxu0 %v1077_v30  ;;  %v1027_v20 = vpack.c.bf16 %v671_v19, %v670_v18  ;;  %v812_v21 = vld [vmem:[%s1361_s6] ss:$0 sm:$0xff] }
  0xe1   :  { %945 = vmatprep.subr.bf16.mxu0 %v1078_v31 }
  0xe2   :  { %v207_v24 = vadd.f32 %v802_v40, %v192_v23 }
  0xe4   :  { %v215_v26 = vmax.f32 %v207_v24, 0.0  ;;  %946 = vmatpush3.bf16.msra.mxu0 %v1078_v31 }
  0xe5   :  { %947 = vmatprep.subr.bf16.mxu0 %v1079_v34 }
  0xe6   :  { %v219_v27 = vpack.c.bf16 %v215_v26, %v214_v25 }
  0xe8   :  { %912 = vmatmul.mubr.bf16.gmra.mrb[4].mxu0 %v219_v27 }
  0xe9   :  { %948 = vmatpush3.bf16.msra.mxu0 %v1079_v34 }
  0xea   :  { %949 = vmatprep.subr.bf16.mxu0 %v1080_v35 }
  0xed   :  { %950 = vmatpush3.bf16.msra.mxu0 %v1080_v35 }
  0xee   :  { %951 = vmatprep.subr.bf16.mxu0 %v1081_v1 }
  0xf1   :  { %952 = vmatpush3.bf16.msra.mxu0 %v1081_v1 }
  0xf2   :  { %953 = vmatprep.subr.bf16.mxu0 %v1082_v2 }
  0xf5   :  { %954 = vmatpush3.bf16.msra.mxu0 %v1082_v2 }
 0x1a3   :  { %v909_v37 = vpop.f32.mrb[0].mxu0 }
 0x1a4   :  { %v334_v38 = vadd.f32 %v909_v37, %v803_v36  ;;  %v325_v39 = vpop.f32.mrb[1].mxu0 }
 0x1a5   :  { %v326_v40 = vadd.f32 %v803_v36, %v325_v39  ;;  %v910_v41 = vpop.f32.mrb[2].mxu0 }
 0x1a6   :  { %v337_v42 = vadd.f32 %v910_v41, %v803_v36  ;;  %v328_v43 = vpop.f32.mrb[3].mxu0  ;;  %v358_v45 = vmax.f32 %v334_v38, 0.0 }
 0x1a7   :  { %v329_v44 = vadd.f32 %v803_v36, %v328_v43  ;;  %v356_v47 = vmax.f32 %v326_v40, 0.0 }
 0x1a8   :  { %v359_v46 = vmax.f32 %v337_v42, 0.0 }
 0x1a9   :  { %v357_v48 = vmax.f32 %v329_v44, 0.0 }
 0x1aa   :  { %v365_v49 = vpack.c.bf16 %v359_v46, %v358_v45 }
 0x1ab   :  { %v364_v50 = vpack.c.bf16 %v357_v48, %v356_v47 }
 0x1ad   :  { %931 = vmatprep.mubr.bf16.mxu1 %v364_v50  ;;  %v672_v50 = vld [vmem:[#allocation6 + $0x60] sm:$0xff] }
 0x1ae   :  { %932 = vmatmul.mubr.bf16.vlgmr.msra.gmra.mrb[0].mxu1 %v365_v49 }
 0x1af   :  { %1010 = vmatpush3.bf16.msra.mxu1 %v1007_v6 }
 0x1b0   :  { %1012 = vmatprep.subr.bf16.mxu1 %v1011_v8 }
 0x1b3   :  { %1014 = vmatpush3.bf16.msra.mxu1 %v1011_v8 }
 0x1b4   :  { %1016 = vmatprep.subr.bf16.mxu1 %v1015_v11 }
 0x1b7   :  { %1018 = vmatpush3.bf16.msra.mxu1 %v1015_v11 }
 0x1b8   :  { %1020 = vmatprep.subr.bf16.mxu1 %v1019_v14 }
 0x1bb   :  { %v913_v51 = vpop.f32.mrb[4].mxu0  ;;  %1022 = vmatpush3.bf16.msra.mxu1 %v1019_v14 }
 0x1bc   :  { %v350_v52 = vadd.f32 %v913_v51, %v803_v36  ;;  %v341_v53 = vpop.f32.mrb[5].mxu0  ;;  %1024 = vmatprep.subr.bf16.mxu1 %v1023_v17  ;;  %v673_v51 = vld [vmem:[#allocation6 + $0x68] sm:$0xff] }
 0x1bd   :  { %v342_v54 = vadd.f32 %v803_v36, %v341_v53  ;;  %v914_v55 = vpop.f32.mrb[6].mxu0  ;;  %v674_v53 = vld [vmem:[#allocation6 + $0x70] sm:$0xff] }
 0x1be   :  { %v353_v56 = vadd.f32 %v914_v55, %v803_v36  ;;  %v344_v57 = vpop.f32.mrb[7].mxu0  ;;  %v362_v59 = vmax.f32 %v350_v52, 0.0  ;;  %v1031_v52 = vpack.c.bf16 %v673_v51, %v672_v50 }
 0x1bf   :  { %v345_v58 = vadd.f32 %v803_v36, %v344_v57  ;;  %v360_v61 = vmax.f32 %v342_v54, 0.0  ;;  %1026 = vmatpush3.bf16.msra.mxu1 %v1023_v17  ;;  %v675_v54 = vld [vmem:[#allocation6 + $0x78] sm:$0xff]  ;;  %v830_v17 = vld [vmem:[%s1365_s10] ss:$0 sm:$0xff] }
 0x1c0   :  { %v363_v60 = vmax.f32 %v353_v56, 0.0  ;;  %1028 = vmatprep.subr.bf16.mxu1 %v1027_v20  ;;  %v1035_v55 = vpack.c.bf16 %v675_v54, %v674_v53  ;;  %v821_v56 = vld [vmem:[%s1363_s8] ss:$0 sm:$0xff] }
 0x1c1   :  { %v361_v62 = vmax.f32 %v345_v58, 0.0 }
 0x1c2   :  { %v367_v63 = vpack.c.bf16 %v363_v60, %v362_v59 }
 0x1c3   :  { %v366_v0 = vpack.c.bf16 %v361_v62, %v360_v61  ;;  %1030 = vmatpush3.bf16.msra.mxu1 %v1027_v20 }
 0x1c4   :  { %1032 = vmatprep.subr.bf16.mxu1 %v1031_v52 }
 0x1c5   :  { %935 = vmatprep.mubr.bf16.mxu1 %v366_v0 }
 0x1c6   :  { %936 = vmatmul.mubr.bf16.gmra.mrb[4].mxu1 %v367_v63 }
 0x1c7   :  { %1034 = vmatpush3.bf16.msra.mxu1 %v1031_v52 }
 0x1c8   :  { %1036 = vmatprep.subr.bf16.mxu1 %v1035_v55 }
 0x1cb   :  { %1038 = vmatpush3.bf16.msra.mxu1 %v1035_v55 }
 0x281   :  { %v933_v22 = vpop.f32.mrb[0].mxu1 }
 0x282   :  { %v482_v23 = vadd.f32 %v933_v22, %v812_v21  ;;  %v473_v24 = vpop.f32.mrb[1].mxu1 }
 0x283   :  { %v474_v25 = vadd.f32 %v812_v21, %v473_v24  ;;  %v934_v26 = vpop.f32.mrb[2].mxu1 }
 0x284   :  { %v485_v27 = vadd.f32 %v934_v26, %v812_v21  ;;  %v476_v28 = vpop.f32.mrb[3].mxu1  ;;  %v506_v32 = vmax.f32 %v482_v23, 0.0 }
 0x285   :  { %v477_v29 = vadd.f32 %v812_v21, %v476_v28  ;;  %v504_v30 = vmax.f32 %v474_v25, 0.0 }
 0x286   :  { %v507_v33 = vmax.f32 %v485_v27, 0.0 }
 0x287   :  { %v505_v31 = vmax.f32 %v477_v29, 0.0 }
 0x288   :  { %v513_v34 = vpack.c.bf16 %v507_v33, %v506_v32 }
 0x289   :  { %v512_v35 = vpack.c.bf16 %v505_v31, %v504_v30 }
 0x28b   :  { %955 = vmatprep.mubr.bf16.mxu0 %v512_v35 }
 0x28c   :  { %956 = vmatmul.mubr.bf16.vlgmr.msra.gmra.mrb[8].mxu0 %v513_v34 }
 0x299   :  { %v937_v36 = vpop.f32.mrb[4].mxu1 }
 0x29a   :  { %v498_v37 = vadd.f32 %v937_v36, %v812_v21  ;;  %v489_v38 = vpop.f32.mrb[5].mxu1 }
 0x29b   :  { %v490_v39 = vadd.f32 %v812_v21, %v489_v38  ;;  %v938_v40 = vpop.f32.mrb[6].mxu1 }
 0x29c   :  { %v501_v41 = vadd.f32 %v938_v40, %v812_v21  ;;  %v492_v42 = vpop.f32.mrb[7].mxu1  ;;  %v510_v44 = vmax.f32 %v498_v37, 0.0 }
 0x29d   :  { %v493_v43 = vadd.f32 %v812_v21, %v492_v42  ;;  %v508_v46 = vmax.f32 %v490_v39, 0.0 }
 0x29e   :  { %v511_v45 = vmax.f32 %v501_v41, 0.0 }
 0x29f   :  { %v509_v47 = vmax.f32 %v493_v43, 0.0 }
 0x2a0   :  { %v515_v48 = vpack.c.bf16 %v511_v45, %v510_v44 }
 0x2a1   :  { %v514_v49 = vpack.c.bf16 %v509_v47, %v508_v46 }
 0x2a3   :  { %959 = vmatprep.mubr.bf16.mxu0 %v514_v49 }
 0x2a4   :  { %960 = vmatmul.mubr.bf16.gmra.mrb[12].mxu0 %v515_v48 }
 0x35f   :  { %v957_v57 = vpop.f32.mrb[8].mxu0 }
 0x360   :  { %v621_v58 = vpop.f32.mrb[9].mxu0  ;;  %v630_v61 = vadd.f32 %v957_v57, %v821_v56 }
 0x361   :  { %v622_v59 = vadd.f32 %v821_v56, %v621_v58  ;;  %v958_v60 = vpop.f32.mrb[10].mxu0 }
 0x362   :  { %v624_v62 = vpop.f32.mrb[11].mxu0  ;;  %v633_v1 = vadd.f32 %v958_v60, %v821_v56  ;;  %v654_v3 = vmax.f32 %v630_v61, 0.0 }
 0x363   :  { %v652_v63 = vmax.f32 %v622_v59, 0.0  ;;  %v625_v0 = vadd.f32 %v821_v56, %v624_v62 }
 0x364   :  { %v655_v4 = vmax.f32 %v633_v1, 0.0 }
 0x365   :  { %v653_v2 = vmax.f32 %v625_v0, 0.0  ;;  %995 = vmatprep.mubr.f32.mxu1 %v652_v63 }
 0x367   :  { %996 = vmatmul.mubr.f32.vlgmr.msra.gmra.mrb[8].mxu1 %v653_v2 }
 0x368   :  { %998 = vmatprep.mubr.f32.mxu1 %v654_v3 }
 0x36b   :  { %999 = vmatmul.mubr.f32.gmra.mrb[10].mxu1 %v655_v4 }
 0x377   :  { %v961_v5 = vpop.f32.mrb[12].mxu0 }
 0x378   :  { %v637_v6 = vpop.f32.mrb[13].mxu0  ;;  %v646_v9 = vadd.f32 %v961_v5, %v821_v56 }
 0x379   :  { %v638_v7 = vadd.f32 %v821_v56, %v637_v6  ;;  %v962_v8 = vpop.f32.mrb[14].mxu0 }
 0x37a   :  { %v640_v10 = vpop.f32.mrb[15].mxu0  ;;  %v649_v13 = vadd.f32 %v962_v8, %v821_v56  ;;  %v658_v15 = vmax.f32 %v646_v9, 0.0 }
 0x37b   :  { %v656_v11 = vmax.f32 %v638_v7, 0.0  ;;  %v641_v12 = vadd.f32 %v821_v56, %v640_v10 }
 0x37c   :  { %v659_v16 = vmax.f32 %v649_v13, 0.0 }
 0x37d   :  { %v657_v14 = vmax.f32 %v641_v12, 0.0  ;;  %1001 = vmatprep.mubr.f32.mxu1 %v656_v11 }
 0x37f   :  { %1002 = vmatmul.mubr.f32.gmra.mrb[12].mxu1 %v657_v14 }
 0x380   :  { %1004 = vmatprep.mubr.f32.mxu1 %v658_v15 }
 0x383   :  { %1005 = vmatmul.mubr.f32.gmra.mrb[14].mxu1 %v659_v16 }
 0x43a   :  { %v997_v18 = vpop.f32.mrb[8].mxu1 }
 0x43b   :  { %v755_v19 = vadd.f32 %v997_v18, %v830_v17  ;;  %v749_v20 = vpop.f32.mrb[9].mxu1 }
 0x43c   :  { %v750_v21 = vadd.f32 %v830_v17, %v749_v20 }
 0x43d   :  { %789 = vst [vmem:[%s1366_s11 + $0x8] sm:$0xff] %v755_v19 }
 0x43e   :  { %788 = vst [vmem:[%s1366_s11] sm:$0xff] %v750_v21  ;;  %v1000_v22 = vpop.f32.mrb[10].mxu1 }
 0x43f   :  { %v765_v23 = vadd.f32 %v1000_v22, %v830_v17  ;;  %v759_v24 = vpop.f32.mrb[11].mxu1 }
 0x440   :  { %v760_v25 = vadd.f32 %v830_v17, %v759_v24 }
 0x441   :  { %791 = vst [vmem:[%s1366_s11 + $0x18] sm:$0xff] %v765_v23 }
 0x442   :  { %790 = vst [vmem:[%s1366_s11 + $0x10] sm:$0xff] %v760_v25 }
 0x452   :  { %v1003_v26 = vpop.f32.mrb[12].mxu1 }
 0x453   :  { %v775_v27 = vadd.f32 %v1003_v26, %v830_v17  ;;  %v769_v28 = vpop.f32.mrb[13].mxu1 }
 0x454   :  { %v770_v29 = vadd.f32 %v830_v17, %v769_v28 }
 0x455   :  { %793 = vst [vmem:[%s1366_s11 + $0x28] sm:$0xff] %v775_v27 }
 0x456   :  { %792 = vst [vmem:[%s1366_s11 + $0x20] sm:$0xff] %v770_v29  ;;  %v1006_v32 = vpop.f32.mrb[14].mxu1 }
 0x457   :  { %v785_v33 = vadd.f32 %v1006_v32, %v830_v17  ;;  %v779_v30 = vpop.f32.mrb[15].mxu1 }
 0x458   :  { %v780_v31 = vadd.f32 %v830_v17, %v779_v30 }
 0x459   :  { %795 = vst [vmem:[%s1366_s11 + $0x38] sm:$0xff] %v785_v33 }
 0x45a   :  { %794 = vst [vmem:[%s1366_s11 + $0x30] sm:$0xff] %v780_v31 }
 0x45b   :  { %800 = vsyncpa [#allocation3], 1 }
 0x45c   :  { %801 = vsyncpa [#allocation5], 1 }

</bundles_post_ra>
